<compile_context>
chip_gen: v6e
topology: v6e:2x2x1
jax: 0.10.0
libtpu: 0.0.40
codegen_flags: <defaults>
</compile_context>

<pallas_src>
import functools

import jax
import jax.numpy as jnp
from jax.experimental import pallas as pl
from jax.experimental.pallas import tpu as pltpu


def _round_up(x, m):
    return ((x + m - 1) // m) * m


def _cdiv(a, b):
    return (a + b - 1) // b


def _critic_kernel(s_ref, a_ref, w1s_ref, w1a_ref, b1_ref,
                   w2_ref, b2_ref, w3_ref, b3_ref, o_ref, *, single_output):
    # s_ref : [TB, num_inputs]  f32      a_ref : [TB, num_actions] f32
    # w1s   : [num_inputs, H]   bf16     w1a   : [num_actions, H]  bf16
    # b1,b2 : [1, H] f32                 w2    : [H, H] bf16
    # w3    : [1, H] f32 (row) if single_output else [H, num_output] f32
    # b3    : [1, num_output] f32
    # o_ref : [TB, num_output] f32
    s = s_ref[...].astype(jnp.bfloat16)
    a = a_ref[...].astype(jnp.bfloat16)

    # Layer 1: split matmul replaces concat(state, action) @ W1.
    h1 = (jnp.dot(s, w1s_ref[...], preferred_element_type=jnp.float32)
          + jnp.dot(a, w1a_ref[...], preferred_element_type=jnp.float32)
          + b1_ref[...])
    h1 = jnp.maximum(h1, 0.0)

    # Layer 2 (dominant matmul).
    h2 = (jnp.dot(h1.astype(jnp.bfloat16), w2_ref[...],
                  preferred_element_type=jnp.float32) + b2_ref[...])
    h2 = jnp.maximum(h2, 0.0)

    # Layer 3.
    if single_output:
        # VPU multiply + cross-lane (XLU) reduce -> [TB, 1].  Avoids a
        # 127-dead-column MXU pass and keeps the HBM store at 4 B/row.
        out = jnp.sum(h2 * w3_ref[...], axis=-1, keepdims=True) + b3_ref[...]
    else:
        out = (jnp.dot(h2, w3_ref[...], preferred_element_type=jnp.float32)
               + b3_ref[...])
    o_ref[...] = out


def _choose_tiling(B, block_b):
    """Pick (padded batch, batch tile, grid steps) with minimal padding.

    - Pad the batch only to a multiple of 8.
    - Use >= 2 grid steps whenever there are >= 16 rows, and an even step
      count when the batch spans multiple tiles, so a "parallel" grid axis
      can shard across v7x's two TensorCores.
    """
    Bp0 = _round_up(B, 8)
    if Bp0 <= block_b:
        n_steps = 2 if Bp0 >= 16 else 1
    else:
        n_steps = _cdiv(Bp0, block_b)
        if n_steps % 2:
            n_steps += 1
    tb = _round_up(_cdiv(Bp0, n_steps), 8)
    Bp = tb * n_steps
    return Bp, tb, n_steps


def critic_forward(state, action, params, *, block_b=2048):
    """Pallas implementation of CriticNet.forward(state, action)."""
    w1s = params["w1s"]; w1a = params["w1a"]; b1 = params["b1"]
    w2 = params["w2"];   b2 = params["b2"]
    w3 = params["w3"];   b3 = params["b3"]
    num_output = int(params["num_output"])

    B, n_in = state.shape
    n_act = action.shape[1]
    H = w2.shape[0]

    single_output = (num_output == 1)
    # For the single-output VPU-reduce path the weight is passed as a [1, H]
    # row; otherwise as [H, num_output] for the MXU dot.
    w3_arg = jnp.transpose(w3) if single_output else w3

    Bp, tb, n_steps = _choose_tiling(B, block_b)
    if Bp != B:
        pad = ((0, Bp - B), (0, 0))
        state = jnp.pad(state, pad)
        action = jnp.pad(action, pad)

    # Deeper multi-buffering for the batch-streamed operands/output once the
    # grid is long enough for pipelining depth to matter.
    pipe = pl.Buffered(3) if n_steps >= 3 else None

    def batch_spec(ncols):
        return pl.BlockSpec((tb, ncols), lambda i: (i, 0), pipeline_mode=pipe)

    def const_spec(arr):
        return pl.BlockSpec(arr.shape, lambda i: (0, 0))

    # Honest (unpadded, real num_output) scheduling hint.
    flops = 2 * B * ((n_in + n_act) * H + H * H + H * num_output)
    bytes_accessed = int(
        4 * B * (n_in + n_act)                            # activations in
        + 2 * (w1s.size + w1a.size + w2.size)             # bf16 weights
        + 4 * (b1.size + b2.size + w3.size + b3.size)     # f32 weights/biases
        + 4 * B * num_output                              # output
    )

    out = pl.pallas_call(
        functools.partial(_critic_kernel, single_output=single_output),
        out_shape=jax.ShapeDtypeStruct((Bp, num_output), jnp.float32),
        grid=(n_steps,),
        in_specs=[
            batch_spec(n_in),           # state tile
            batch_spec(n_act),          # action tile
            const_spec(w1s), const_spec(w1a), const_spec(b1),
            const_spec(w2), const_spec(b2),
            const_spec(w3_arg), const_spec(b3),
        ],
        out_specs=pl.BlockSpec((tb, num_output), lambda i: (i, 0),
                               pipeline_mode=pipe),
        compiler_params=pltpu.CompilerParams(
            dimension_semantics=("parallel",)),
        cost_estimate=pl.CostEstimate(
            flops=flops, transcendentals=0, bytes_accessed=bytes_accessed),
    )(state, action, w1s, w1a, b1, w2, b2, w3_arg, b3)

    # Drop batch padding -> [B, num_output].
    return out[:B, :]


def init_critic_params(key, num_inputs, num_actions, num_output=1,
                       hidden_size=256, init_w=0.003):
    """Mirrors the PyTorch module's init.

    linear1/linear2: default uniform(-1/sqrt(fan_in), 1/sqrt(fan_in)).
    linear3        : uniform(-init_w, init_w) for weight and bias.
    Weights stored pre-transposed [in, out]; the two big matmul weights are
    kept in bf16, the tiny final layer and all biases stay f32.  W1 is
    pre-split into state / action halves so the kernel never needs the
    concatenated input.
    """
    d_in = num_inputs + num_actions
    k = jax.random.split(key, 6)

    bound1 = 1.0 / float(jnp.sqrt(jnp.float32(d_in)))
    w1 = jax.random.uniform(k[0], (d_in, hidden_size), jnp.float32,
                            -bound1, bound1)
    b1 = jax.random.uniform(k[1], (1, hidden_size), jnp.float32,
                            -bound1, bound1)

    bound2 = 1.0 / float(jnp.sqrt(jnp.float32(hidden_size)))
    w2 = jax.random.uniform(k[2], (hidden_size, hidden_size), jnp.float32,
                            -bound2, bound2)
    b2 = jax.random.uniform(k[3], (1, hidden_size), jnp.float32,
                            -bound2, bound2)

    w3 = jax.random.uniform(k[4], (hidden_size, num_output), jnp.float32,
                            -init_w, init_w)
    b3 = jax.random.uniform(k[5], (1, num_output), jnp.float32,
                            -init_w, init_w)

    return {
        "w1s": w1[:num_inputs, :].astype(jnp.bfloat16),
        "w1a": w1[num_inputs:, :].astype(jnp.bfloat16),
        "b1": b1,
        "w2": w2.astype(jnp.bfloat16),
        "b2": b2,
        "w3": w3,            # f32, tiny
        "b3": b3,            # f32
        "num_output": num_output,
    }


def _reference_forward(state, action, params):
    """Pure-JAX reference with the same bf16-in / f32-accumulate numerics."""
    w1s = params["w1s"]; w1a = params["w1a"]; b1 = params["b1"]
    w2 = params["w2"];   b2 = params["b2"]
    w3 = params["w3"];   b3 = params["b3"]

    h1 = (jnp.dot(state.astype(jnp.bfloat16), w1s,
                  preferred_element_type=jnp.float32)
          + jnp.dot(action.astype(jnp.bfloat16), w1a,
                    preferred_element_type=jnp.float32) + b1)
    h1 = jnp.maximum(h1, 0.0)
    h2 = jnp.dot(h1.astype(jnp.bfloat16), w2,
                 preferred_element_type=jnp.float32) + b2
    h2 = jnp.maximum(h2, 0.0)
    return jnp.dot(h2, w3, preferred_element_type=jnp.float32) + b3


if __name__ == "__main__":
    num_inputs = 24
    num_actions = 8
    hidden_size = 256

    key = jax.random.PRNGKey(0)
    k_state, k_action, k_params, k_params3 = jax.random.split(key, 4)

    params1 = init_critic_params(k_params, num_inputs, num_actions,
                                 num_output=1, hidden_size=hidden_size)
    params3 = init_critic_params(k_params3, num_inputs, num_actions,
                                 num_output=3, hidden_size=hidden_size)

    # Test 1: tiny batch (single grid step), num_output=1 reduce path.
    b1_ = 8
    s1 = jax.random.normal(k_state, (b1_, num_inputs), jnp.float32)
    a1 = jax.random.normal(k_action, (b1_, num_actions), jnp.float32)
    out1 = jax.block_until_ready(critic_forward(s1, a1, params1))
    ref1 = _reference_forward(s1, a1, params1)
    assert out1.shape == (b1_, 1), out1.shape
    assert jnp.allclose(out1, ref1, atol=1e-3, rtol=1e-3)

    # Test 2: ragged batch with a small tile -> multi-step even grid,
    # Buffered(3) pipelining, batch-padding slice-off.
    b2_ = 520
    s2 = jax.random.normal(jax.random.PRNGKey(1), (b2_, num_inputs), jnp.float32)
    a2 = jax.random.normal(jax.random.PRNGKey(2), (b2_, num_actions), jnp.float32)
    out2 = jax.block_until_ready(critic_forward(s2, a2, params1, block_b=64))
    ref2 = _reference_forward(s2, a2, params1)
    assert out2.shape == (b2_, 1), out2.shape
    assert jnp.allclose(out2, ref2, atol=1e-3, rtol=1e-3)

    # Test 3: num_output > 1 -> narrow MXU-dot output path, 2-step grid.
    b3_ = 16
    s3 = jax.random.normal(jax.random.PRNGKey(3), (b3_, num_inputs), jnp.float32)
    a3 = jax.random.normal(jax.random.PRNGKey(4), (b3_, num_actions), jnp.float32)
    out3 = jax.block_until_ready(critic_forward(s3, a3, params3))
    ref3 = _reference_forward(s3, a3, params3)
    assert out3.shape == (b3_, 3), out3.shape
    assert jnp.allclose(out3, ref3, atol=1e-3, rtol=1e-3)

    print("KERNEL_OK")
</pallas_src>

<mosaic_0001>
module attributes {stable_mosaic.version = 11 : i64} {
  func.func @_critic_kernel(%arg0: i32, %arg1: memref<8x24xf32, #tpu.memory_space<vmem>>, %arg2: memref<8x8xf32, #tpu.memory_space<vmem>>, %arg3: memref<24x256xbf16, #tpu.memory_space<vmem>>, %arg4: memref<8x256xbf16, #tpu.memory_space<vmem>>, %arg5: memref<1x256xf32, #tpu.memory_space<vmem>>, %arg6: memref<256x256xbf16, #tpu.memory_space<vmem>>, %arg7: memref<1x256xf32, #tpu.memory_space<vmem>>, %arg8: memref<1x256xf32, #tpu.memory_space<vmem>>, %arg9: memref<1x1xf32, #tpu.memory_space<vmem>>, %arg10: memref<8x1xf32, #tpu.memory_space<vmem>>) attributes {dimension_semantics = [#tpu.dimension_semantics<parallel>], iteration_bounds = array<i64: 1>, scalar_prefetch = 0 : i64, scratch_operands = 0 : i64, tpu.core_type = #tpu.core_type<tc>, window_params = [{transform_indices = @transform_0, window_bounds = array<i64: 8, 24>}, {transform_indices = @transform_1, window_bounds = array<i64: 8, 8>}, {pipeline_mode = #tpu.pipeline_mode<synchronous>, transform_indices = @transform_2, window_bounds = array<i64: 24, 256>}, {pipeline_mode = #tpu.pipeline_mode<synchronous>, transform_indices = @transform_3, window_bounds = array<i64: 8, 256>}, {pipeline_mode = #tpu.pipeline_mode<synchronous>, transform_indices = @transform_4, window_bounds = array<i64: 1, 256>}, {pipeline_mode = #tpu.pipeline_mode<synchronous>, transform_indices = @transform_5, window_bounds = array<i64: 256, 256>}, {pipeline_mode = #tpu.pipeline_mode<synchronous>, transform_indices = @transform_6, window_bounds = array<i64: 1, 256>}, {pipeline_mode = #tpu.pipeline_mode<synchronous>, transform_indices = @transform_7, window_bounds = array<i64: 1, 256>}, {pipeline_mode = #tpu.pipeline_mode<synchronous>, transform_indices = @transform_8, window_bounds = array<i64: 1, 1>}, {transform_indices = @transform_9, window_bounds = array<i64: 8, 1>}]} {
    %c0 = arith.constant 0 : index
    %c0_0 = arith.constant 0 : index
    %0 = vector.load %arg1[%c0, %c0_0] : memref<8x24xf32, #tpu.memory_space<vmem>>, vector<8x24xf32>
    %1 = arith.truncf %0 : vector<8x24xf32> to vector<8x24xbf16>
    %c0_1 = arith.constant 0 : index
    %c0_2 = arith.constant 0 : index
    %2 = vector.load %arg2[%c0_1, %c0_2] : memref<8x8xf32, #tpu.memory_space<vmem>>, vector<8x8xf32>
    %3 = arith.truncf %2 : vector<8x8xf32> to vector<8x8xbf16>
    %c0_3 = arith.constant 0 : index
    %c0_4 = arith.constant 0 : index
    %4 = vector.load %arg3[%c0_3, %c0_4] : memref<24x256xbf16, #tpu.memory_space<vmem>>, vector<24x256xbf16>
    %cst = arith.constant dense<0.000000e+00> : vector<8x256xf32>
    %5 = tpu.matmul %1, %4, %cst {dimension_numbers = #tpu.dot_dimension_numbers<[1], [0], [0], [1], [0, 0, 1, 1], [], []>} : vector<8x24xbf16>, vector<24x256xbf16>, vector<8x256xf32> -> vector<8x256xf32>
    %c0_5 = arith.constant 0 : index
    %c0_6 = arith.constant 0 : index
    %6 = vector.load %arg4[%c0_5, %c0_6] : memref<8x256xbf16, #tpu.memory_space<vmem>>, vector<8x256xbf16>
    %cst_7 = arith.constant dense<0.000000e+00> : vector<8x256xf32>
    %7 = tpu.matmul %3, %6, %cst_7 {dimension_numbers = #tpu.dot_dimension_numbers<[1], [0], [0], [1], [0, 0, 1, 1], [], []>} : vector<8x8xbf16>, vector<8x256xbf16>, vector<8x256xf32> -> vector<8x256xf32>
    %8 = arith.addf %5, %7 : vector<8x256xf32>
    %c0_8 = arith.constant 0 : index
    %c0_9 = arith.constant 0 : index
    %9 = vector.load %arg5[%c0_8, %c0_9] : memref<1x256xf32, #tpu.memory_space<vmem>>, vector<1x256xf32>
    %10 = vector.broadcast %9 : vector<1x256xf32> to vector<8x256xf32>
    %11 = arith.addf %8, %10 : vector<8x256xf32>
    %cst_10 = arith.constant 0.000000e+00 : f32
    %12 = vector.broadcast %cst_10 : f32 to vector<8x256xf32>
    %13 = arith.maximumf %11, %12 : vector<8x256xf32>
    %14 = arith.truncf %13 : vector<8x256xf32> to vector<8x256xbf16>
    %c0_11 = arith.constant 0 : index
    %c0_12 = arith.constant 0 : index
    %15 = vector.load %arg6[%c0_11, %c0_12] : memref<256x256xbf16, #tpu.memory_space<vmem>>, vector<256x256xbf16>
    %cst_13 = arith.constant dense<0.000000e+00> : vector<8x256xf32>
    %16 = tpu.matmul %14, %15, %cst_13 {dimension_numbers = #tpu.dot_dimension_numbers<[1], [0], [0], [1], [0, 0, 1, 1], [], []>} : vector<8x256xbf16>, vector<256x256xbf16>, vector<8x256xf32> -> vector<8x256xf32>
    %c0_14 = arith.constant 0 : index
    %c0_15 = arith.constant 0 : index
    %17 = vector.load %arg7[%c0_14, %c0_15] : memref<1x256xf32, #tpu.memory_space<vmem>>, vector<1x256xf32>
    %18 = vector.broadcast %17 : vector<1x256xf32> to vector<8x256xf32>
    %19 = arith.addf %16, %18 : vector<8x256xf32>
    %cst_16 = arith.constant 0.000000e+00 : f32
    %20 = vector.broadcast %cst_16 : f32 to vector<8x256xf32>
    %21 = arith.maximumf %19, %20 : vector<8x256xf32>
    %c0_17 = arith.constant 0 : index
    %c0_18 = arith.constant 0 : index
    %22 = vector.load %arg8[%c0_17, %c0_18] : memref<1x256xf32, #tpu.memory_space<vmem>>, vector<1x256xf32>
    %23 = vector.broadcast %22 : vector<1x256xf32> to vector<8x256xf32>
    %24 = arith.mulf %21, %23 : vector<8x256xf32>
    %cst_19 = arith.constant dense<0.000000e+00> : vector<8xf32>
    %25 = vector.multi_reduction <add>, %24, %cst_19 [1] : vector<8x256xf32> to vector<8xf32>
    %26 = vector.shape_cast %25 : vector<8xf32> to vector<8x1xf32>
    %c0_20 = arith.constant 0 : index
    %c0_21 = arith.constant 0 : index
    %27 = vector.load %arg9[%c0_20, %c0_21] : memref<1x1xf32, #tpu.memory_space<vmem>>, vector<1x1xf32>
    %28 = vector.broadcast %27 : vector<1x1xf32> to vector<8x1xf32>
    %29 = arith.addf %26, %28 : vector<8x1xf32>
    %c0_22 = arith.constant 0 : index
    %c0_23 = arith.constant 0 : index
    %30 = vector.load %arg10[%c0_22, %c0_23] : memref<8x1xf32, #tpu.memory_space<vmem>>, vector<8x1xf32>
    tpu.vector_store %arg10[%c0_22, %c0_23], %29 {strides = array<i32>} : memref<8x1xf32, #tpu.memory_space<vmem>>, vector<8x1xf32>,
    return
  }
  func.func @transform_0(%arg0: i32) -> (i32, i32) {
    %c0_i32 = arith.constant 0 : i32
    %c0_i32_0 = arith.constant 0 : i32
    return %arg0, %c0_i32 : i32, i32
  }
  func.func @transform_1(%arg0: i32) -> (i32, i32) {
    %c0_i32 = arith.constant 0 : i32
    %c0_i32_0 = arith.constant 0 : i32
    return %arg0, %c0_i32 : i32, i32
  }
  func.func @transform_2(%arg0: i32) -> (i32, i32) {
    %c0_i32 = arith.constant 0 : i32
    %c0_i32_0 = arith.constant 0 : i32
    %c0_i32_1 = arith.constant 0 : i32
    return %c0_i32, %c0_i32_0 : i32, i32
  }
  func.func @transform_3(%arg0: i32) -> (i32, i32) {
    %c0_i32 = arith.constant 0 : i32
    %c0_i32_0 = arith.constant 0 : i32
    %c0_i32_1 = arith.constant 0 : i32
    return %c0_i32, %c0_i32_0 : i32, i32
  }
  func.func @transform_4(%arg0: i32) -> (i32, i32) {
    %c0_i32 = arith.constant 0 : i32
    %c0_i32_0 = arith.constant 0 : i32
    %c0_i32_1 = arith.constant 0 : i32
    return %c0_i32, %c0_i32_0 : i32, i32
  }
  func.func @transform_5(%arg0: i32) -> (i32, i32) {
    %c0_i32 = arith.constant 0 : i32
    %c0_i32_0 = arith.constant 0 : i32
    %c0_i32_1 = arith.constant 0 : i32
    return %c0_i32, %c0_i32_0 : i32, i32
  }
  func.func @transform_6(%arg0: i32) -> (i32, i32) {
    %c0_i32 = arith.constant 0 : i32
    %c0_i32_0 = arith.constant 0 : i32
    %c0_i32_1 = arith.constant 0 : i32
    return %c0_i32, %c0_i32_0 : i32, i32
  }
  func.func @transform_7(%arg0: i32) -> (i32, i32) {
    %c0_i32 = arith.constant 0 : i32
    %c0_i32_0 = arith.constant 0 : i32
    %c0_i32_1 = arith.constant 0 : i32
    return %c0_i32, %c0_i32_0 : i32, i32
  }
  func.func @transform_8(%arg0: i32) -> (i32, i32) {
    %c0_i32 = arith.constant 0 : i32
    %c0_i32_0 = arith.constant 0 : i32
    %c0_i32_1 = arith.constant 0 : i32
    return %c0_i32, %c0_i32_0 : i32, i32
  }
  func.func @transform_9(%arg0: i32) -> (i32, i32) {
    %c0_i32 = arith.constant 0 : i32
    %c0_i32_0 = arith.constant 0 : i32
    return %arg0, %c0_i32 : i32, i32
  }
}

</mosaic_0001>

<bundles_post_ra>
// kernel: tpu_custom_call.1
= control target key start
LH: loop header
LB: loop body
LE: loop exit
PB: predicated region body
PF: predicated region fallthrough
CT: control target
= control target key end

     0   :  { %s831_s0 = inlined_call_operand.hbm [shape: f32[8,24], index: 0, kind: input, shape index: {}]   ;;  %s832_s1 = inlined_call_operand.hbm [shape: f32[8,8], index: 1, kind: input, shape index: {}]   ;;  %s833_s2 = inlined_call_operand.hbm [shape: bf16[24,256], index: 2, kind: input, shape index: {}]   ;;  %s834_s3 = inlined_call_operand.hbm [shape: bf16[8,256], index: 3, kind: input, shape index: {}]   ;;  %s835_s4 = inlined_call_operand.vmem [shape: f32[1,256], index: 4, kind: input, shape index: {}]   ;;  %s836_s5 = inlined_call_operand.hbm [shape: bf16[256,256], index: 5, kind: input, shape index: {}]   ;;  %s837_s6 = inlined_call_operand.vmem [shape: f32[1,256], index: 6, kind: input, shape index: {}]   ;;  %s838_s7 = inlined_call_operand.vmem [shape: f32[1,256], index: 7, kind: input, shape index: {}]   ;;  %s839_s8 = inlined_call_operand.<no memory space> [shape: f32[1,1], index: 8, kind: input, shape index: {}]   ;;  %s840_s9 = inlined_call_operand.vmem [shape: f32[8,1], index: 9, kind: output, shape index: {}]  }
   0x1   :  { %v14_v0 = vstv %s839_s8 }
   0x2   :  { %15 = vst [vmem:[#allocation2] sm:$0x1] %v14_v0 }
   0x3   :  { %16 = vsyncpa [#allocation4], 0 }
   0x4   :  { %17 = vsyncpa [#allocation6], 0 }
   0x5   :  { %18 = vsyncpa [#allocation9], 0  ;;  %s739_s11 = smov [#allocation5]   ;;  %s740_s13 = smov [#allocation8]  }
   0x6   :  { %s35_s12 = sshll.u32 %s739_s11, 4  ;;  %s57_s14 = sshll.u32 %s740_s13, 4  ;;  %s36_s12 = int_to_ptr.vmem [resolvable:$true] %s35_s12  ;;  %s58_s14 = int_to_ptr.vmem [resolvable:$true] %s57_s14 }
   0x7   :  { %s641_s15 = scalar_lea.vmem %s36_s12, 128  ;;  %p646_p1 = scmp.lt.s32.totalorder %s36_s12, %s36_s12 }
   0x8   :  { %p642_p0 = scmp.ne.s32.totalorder %s36_s12, %s641_s15  ;;  %p647_p2 = scmp.lt.s32.totalorder %s641_s15, %s641_s15 }
   0xa   :  { %p648_p3 = por %p647_p2, %p646_p1 }
   0xc   :  { %p649_p4 = pnand %p648_p3, %p642_p0 }
   0xe   :  { %652 = shalt.err (!%p649_p4)
}
   0xf   :  { %38 = dma.hbm_to_vmem [thread:$0]  %s832_s1, 128, %s36_s12, [#allocation6]  }
  0x10   :  { %s661_s8 = scalar_lea.vmem %s58_s14, 128  ;;  %p666_p6 = scmp.lt.s32.totalorder %s58_s14, %s58_s14 }
  0x11   :  { %p662_p5 = scmp.ne.s32.totalorder %s58_s14, %s661_s8  ;;  %p667_p7 = scmp.lt.s32.totalorder %s661_s8, %s661_s8 }
  0x13   :  { %p668_p8 = por %p667_p7, %p666_p6 }
  0x15   :  { %p669_p9 = pnand %p668_p8, %p662_p5 }
  0x17   :  { %672 = shalt.err (!%p669_p9)
}
  0x18   :  { %60 = dma.hbm_to_vmem [thread:$0]  %s834_s3, 128, %s58_s14, [#allocation9]  }
  0x19   :  { %s741_s20 = smov [#allocation3]   ;;  %s742_s22 = smov [#allocation7]  }
  0x1a   :  { %s25_s21 = sshll.u32 %s741_s20, 4  ;;  %s44_s23 = sshll.u32 %s742_s22, 4  ;;  %s26_s21 = int_to_ptr.vmem [resolvable:$true] %s25_s21  ;;  %s45_s23 = int_to_ptr.vmem [resolvable:$true] %s44_s23 }
  0x1b   :  { %s681_s24 = scalar_lea.vmem %s26_s21, 128  ;;  %p686_p11 = scmp.lt.s32.totalorder %s26_s21, %s26_s21 }
  0x1c   :  { %p682_p10 = scmp.ne.s32.totalorder %s26_s21, %s681_s24  ;;  %p687_p12 = scmp.lt.s32.totalorder %s681_s24, %s681_s24 }
  0x1e   :  { %p688_p13 = por %p687_p12, %p686_p11 }
  0x20   :  { %p689_p0 = pnand %p688_p13, %p682_p10 }
  0x22   :  { %692 = shalt.err (!%p689_p0)
}
  0x23   :  { %28 = dma.hbm_to_vmem [thread:$0]  %s831_s0, 128, %s26_s21, [#allocation4]  }
  0x24   :  { %s701_s26 = scalar_lea.vmem %s45_s23, 384  ;;  %p706_p2 = scmp.lt.s32.totalorder %s45_s23, %s45_s23 }
  0x25   :  { %p702_p1 = scmp.ne.s32.totalorder %s45_s23, %s701_s26  ;;  %p707_p3 = scmp.lt.s32.totalorder %s701_s26, %s701_s26 }
  0x27   :  { %p708_p4 = por %p707_p3, %p706_p2 }
  0x29   :  { %p709_p5 = pnand %p708_p4, %p702_p1 }
  0x2b   :  { %712 = shalt.err (!%p709_p5)
}
  0x2c   :  { %s743_s3 = smov 128   ;;  %s744_s27 = smov 8  }
  0x2d   :  { %50 = dma.hbm_to_vmem [thread:$0]  %s833_s2, 384, %s45_s23, [#allocation6], %s743_s3, %s743_s3, %s744_s27  }
  0x2e   :  { %s745_s30 = smov [#allocation10]  }
  0x2f   :  { %s68_s10 = sshll.u32 %s745_s30, 4  ;;  %s69_s10 = int_to_ptr.vmem [resolvable:$true] %s68_s10 }
  0x30   :  { %s721_s11 = scalar_lea.vmem %s69_s10, 4096  ;;  %p726_p7 = scmp.lt.s32.totalorder %s69_s10, %s69_s10 }
  0x31   :  { %p722_p6 = scmp.ne.s32.totalorder %s69_s10, %s721_s11  ;;  %p727_p8 = scmp.lt.s32.totalorder %s721_s11, %s721_s11 }
  0x33   :  { %p728_p9 = por %p727_p8, %p726_p7 }
  0x35   :  { %p729_p10 = pnand %p728_p9, %p722_p6 }
  0x37   :  { %732 = shalt.err (!%p729_p10)
}
  0x38   :  { %74 = dma.hbm_to_vmem [thread:$0]  %s836_s5, 4096, %s69_s10, [#allocation9], %s743_s3, %s743_s3, %s744_s27  }
  0x39   :  { %733 = dma.done.wait [#allocation4], 128  }
  0x3a   :  { %734 = vsyncadd [#allocation4], 4294967168 }
  0x3b   :  { %735 = dma.done.wait [#allocation6], 512  }
  0x3c   :  { %736 = vsyncadd [#allocation6], 4294966784 }
  0x3d   :  { %737 = dma.done.wait [#allocation9], 4224  }
  0x3e   :  { %738 = vsyncadd [#allocation9], 4294963072  ;;  %v746_v1 = vmov 0   ;;  %v104_v2 = vld [vmem:[#allocation8] sm:$0xff]  ;;  %vm114_vm0 = vcmask 1043456   ;;  %v103_v4 = vld [vmem:[#allocation7 + $0x10] sm:$0xff]  ;;  %v230_v48 = vlaneseq }
  0x3f   :  { %153 = vmatprep.mubr.bf16.mxu1 %v746_v1  ;;  %v99_v3 = vld [vmem:[#allocation5] sm:$0xff]  ;;  %v528_v5 = vcombine.high %v104_v2, %v104_v2  ;;  %v527_v6 = vcombine.low %v104_v2, %v104_v2  ;;  %v534_v7 = vcombine.high %v103_v4, %v103_v4  ;;  %v533_v8 = vcombine.low %v103_v4, %v103_v4  ;;  %v588_v13 = vld [vmem:[#allocation10 + $0x64] ss:$8 sps:$4 sm:$0xff]   ;;  %v590_v16 = vld [vmem:[#allocation10 + $0x60] ss:$8 sps:$4 sm:$0xff]  }
  0x40   :  { %v100_v10 = vpack.c.bf16 %v99_v3, %v99_v3  ;;  %v585_v11 = vld [vmem:[#allocation10 + $0x74] ss:$8 sps:$4 sm:$0xff]   ;;  %v587_v12 = vld [vmem:[#allocation10 + $0x70] ss:$8 sps:$4 sm:$0xff]   ;;  %vm110_vm1 = vcmask 64512   ;;  %vm177_vm2 = vcmask 195584  }
  0x41   :  { %529 = vmatprep.subr.msk.bf16.mxu1 %vm114_vm0, %v528_v5  ;;  %v116_v9 = vsel %vm114_vm0, %v527_v6, 0  ;;  %v182_v14 = vsel %vm114_vm0, %v533_v8, 0  ;;  %v584_v15 = vld [vmem:[#allocation7 + $0x4] ss:$8 sps:$4 sm:$0xff]   ;;  %450 = vmatprep.subr.bf16.mxu0 %v585_v11  ;;  %v582_v17 = vld [vmem:[#allocation7] ss:$8 sps:$4 sm:$0xff]  }
  0x42   :  { %136 = vmatpush1.bf16.msra.mxu1 %v116_v9  ;;  %451 = vmatpush1.bf16.msra.mxu0 %v587_v12  ;;  %v591_v18 = vld [vmem:[#allocation10 + $0x54] ss:$8 sps:$4 sm:$0xff]   ;;  %v593_v20 = vld [vmem:[#allocation10 + $0x50] ss:$8 sps:$4 sm:$0xff]   ;;  %v594_v22 = vld [vmem:[#allocation10 + $0x44] ss:$8 sps:$4 sm:$0xff]  }
  0x43   :  { %535 = vmatprep.subr.msk.bf16.mxu1 %vm114_vm0, %v534_v7  ;;  %452 = vmatprep.subr.bf16.mxu0 %v588_v13  ;;  %v97_v19 = vld [vmem:[#allocation3] sm:$0xff]  ;;  %v596_v23 = vld [vmem:[#allocation10 + $0x40] ss:$8 sps:$4 sm:$0xff]   ;;  %v600_v26 = vld [vmem:[#allocation10 + $0x24] ss:$8 sps:$4 sm:$0xff]   ;;  %v231_v49 = vshrl.u32 %v230_v48, 7 }
  0x44   :  { %v98_v21 = vpack.c.bf16 %v97_v19, %v97_v19  ;;  %v597_v24 = vld [vmem:[#allocation10 + $0x34] ss:$8 sps:$4 sm:$0xff]   ;;  %v599_v25 = vld [vmem:[#allocation10 + $0x30] ss:$8 sps:$4 sm:$0xff]   ;;  %v602_v27 = vld [vmem:[#allocation10 + $0x20] ss:$8 sps:$4 sm:$0xff]  }
  0x45   :  { %530 = vmatmul.mubr.msk.bf16.vlgmr.msra.gmra.mxu1 %vm110_vm1, %v100_v10  ;;  %v603_v28 = vld [vmem:[#allocation10 + $0x14] ss:$8 sps:$4 sm:$0xff]   ;;  %v605_v29 = vld [vmem:[#allocation10 + $0x10] ss:$8 sps:$4 sm:$0xff]   ;;  %v606_v30 = vld [vmem:[#allocation10 + $0x4] ss:$8 sps:$4 sm:$0xff]  }
  0x46   :  { %200 = vmatpush1.bf16.msra.mxu1 %v182_v14  ;;  %219 = vmatprep.mubr.bf16.mxu1 %v746_v1  ;;  %v608_v31 = vld [vmem:[#allocation10] ss:$8 sps:$4 sm:$0xff]   ;;  %v609_v32 = vld [vmem:[#allocation10 + $0xf4] ss:$8 sps:$4 sm:$0xff]   ;;  %v611_v33 = vld [vmem:[#allocation10 + $0xf0] ss:$8 sps:$4 sm:$0xff]  }
  0x47   :  { %201 = vmatprep.subr.bf16.mxu1 %v584_v15  ;;  %453 = vmatpush1.bf16.msra.mxu0 %v590_v16  ;;  %v612_v34 = vld [vmem:[#allocation10 + $0xe4] ss:$8 sps:$4 sm:$0xff]   ;;  %v614_v35 = vld [vmem:[#allocation10 + $0xe0] ss:$8 sps:$4 sm:$0xff]   ;;  %v615_v36 = vld [vmem:[#allocation10 + $0xd4] ss:$8 sps:$4 sm:$0xff]  }
  0x48   :  { %454 = vmatprep.subr.bf16.mxu0 %v591_v18  ;;  %v617_v37 = vld [vmem:[#allocation10 + $0xd0] ss:$8 sps:$4 sm:$0xff]   ;;  %v618_v38 = vld [vmem:[#allocation10 + $0xc4] ss:$8 sps:$4 sm:$0xff]   ;;  %v620_v39 = vld [vmem:[#allocation10 + $0xc0] ss:$8 sps:$4 sm:$0xff]  }
  0x49   :  { %v621_v40 = vld [vmem:[#allocation10 + $0xb4] ss:$8 sps:$4 sm:$0xff]   ;;  %v623_v41 = vld [vmem:[#allocation10 + $0xb0] ss:$8 sps:$4 sm:$0xff]   ;;  %v624_v42 = vld [vmem:[#allocation10 + $0xa4] ss:$8 sps:$4 sm:$0xff]  }
  0x4a   :  { %202 = vmatpush1.bf16.msra.mxu1 %v582_v17  ;;  %v626_v43 = vld [vmem:[#allocation10 + $0xa0] ss:$8 sps:$4 sm:$0xff]   ;;  %v627_v44 = vld [vmem:[#allocation10 + $0x94] ss:$8 sps:$4 sm:$0xff]   ;;  %v629_v45 = vld [vmem:[#allocation10 + $0x90] ss:$8 sps:$4 sm:$0xff]  }
  0x4b   :  { %455 = vmatpush1.bf16.msra.mxu0 %v593_v20  ;;  %v630_v46 = vld [vmem:[#allocation10 + $0x84] ss:$8 sps:$4 sm:$0xff]   ;;  %v632_v47 = vld [vmem:[#allocation10 + $0x80] ss:$8 sps:$4 sm:$0xff]   ;;  %v232_v52 = vsub.s32 0, %v231_v49  ;;  %v236_v55 = vsub.s32 1, %v231_v49 }
  0x4c   :  { %456 = vmatprep.subr.bf16.mxu0 %v594_v22  ;;  %v228_v54 = vld [vmem:[%s835_s4] sm:$0x3]  ;;  %vm518_vm3 = vcmask 7168  }
  0x4d   :  { %536 = vmatmul.mubr.msk.bf16.vlgmr.msra.gmra.mxu1 %vm177_vm2, %v98_v21  ;;  %v233_v57 = vrot.slane %v228_v54, %v232_v52  ;;  %v237_v60 = vrot.slane %v228_v54, %v236_v55  ;;  %v278_v7 = vld [vmem:[%s837_s6] sm:$0x3] }
  0x4e   :  { %v283_v8 = vrot.slane %v278_v7, %v232_v52  ;;  %v287_v9 = vrot.slane %v278_v7, %v236_v55  ;;  %v493_v11 = vld [vmem:[%s838_s7] sm:$0x3] }
  0x4f   :  { %457 = vmatpush1.bf16.msra.mxu0 %v596_v23  ;;  %v498_v16 = vrot.slane %v493_v11, %v232_v52  ;;  %v502_v17 = vrot.slane %v493_v11, %v236_v55 }
  0x50   :  { %458 = vmatprep.subr.bf16.mxu0 %v597_v24  ;;  %v569_v24 = vld [vmem:[#allocation2] ss:$0 sm:$0xff] }
  0x53   :  { %459 = vmatpush1.bf16.msra.mxu0 %v599_v25 }
  0x54   :  { %460 = vmatprep.subr.bf16.mxu0 %v600_v26 }
  0x57   :  { %461 = vmatpush1.bf16.msra.mxu0 %v602_v27 }
  0x58   :  { %462 = vmatprep.subr.bf16.mxu0 %v603_v28 }
  0x5b   :  { %463 = vmatpush1.bf16.msra.mxu0 %v605_v29 }
  0x5c   :  { %464 = vmatprep.subr.bf16.mxu0 %v606_v30 }
  0x5f   :  { %465 = vmatpush1.bf16.msra.mxu0 %v608_v31 }
  0x60   :  { %466 = vmatprep.subr.bf16.mxu0 %v609_v32 }
  0x63   :  { %467 = vmatpush2.bf16.msra.mxu0 %v611_v33 }
  0x64   :  { %468 = vmatprep.subr.bf16.mxu0 %v612_v34 }
  0x67   :  { %469 = vmatpush2.bf16.msra.mxu0 %v614_v35 }
  0x68   :  { %470 = vmatprep.subr.bf16.mxu0 %v615_v36 }
  0x6b   :  { %471 = vmatpush2.bf16.msra.mxu0 %v617_v37 }
  0x6c   :  { %472 = vmatprep.subr.bf16.mxu0 %v618_v38 }
  0x6f   :  { %473 = vmatpush2.bf16.msra.mxu0 %v620_v39 }
  0x70   :  { %474 = vmatprep.subr.bf16.mxu0 %v621_v40 }
  0x73   :  { %475 = vmatpush2.bf16.msra.mxu0 %v623_v41 }
  0x74   :  { %476 = vmatprep.subr.bf16.mxu0 %v624_v42 }
  0x77   :  { %477 = vmatpush2.bf16.msra.mxu0 %v626_v43 }
  0x78   :  { %478 = vmatprep.subr.bf16.mxu0 %v627_v44 }
  0x7b   :  { %479 = vmatpush2.bf16.msra.mxu0 %v629_v45 }
  0x7c   :  { %480 = vmatprep.subr.bf16.mxu0 %v630_v46 }
  0x7f   :  { %481 = vmatpush2.bf16.msra.mxu0 %v632_v47 }
 0x105   :  { %v155_v50 = vpop.f32.mrf.mxu1 }
 0x107   :  { %v157_v51 = vpop.f32.mrf.mxu1 }
 0x109   :  { %v159_v53 = vpop.f32.mrf.mxu1 }
 0x10b   :  { %v160_v56 = vpop.f32.mrf.mxu1 }
 0x10d   :  { %v221_v58 = vpop.f32.mrf.mxu1 }
 0x10e   :  { %v222_v59 = vadd.f32 %v221_v58, %v155_v50 }
 0x10f   :  { %v223_v61 = vpop.f32.mrf.mxu1 }
 0x110   :  { %v240_v62 = vadd.f32 %v233_v57, %v222_v59  ;;  %v224_v63 = vadd.f32 %v223_v61, %v157_v51 }
 0x111   :  { %v225_v0 = vpop.f32.mrf.mxu1 }
 0x112   :  { %v241_v1 = vadd.f32 %v237_v60, %v224_v63  ;;  %v242_v2 = vmax.f32 %v240_v62, 0.0 }
 0x113   :  { %v226_v3 = vpop.f32.mrf.mxu1 }
 0x114   :  { %v243_v4 = vmax.f32 %v241_v1, 0.0  ;;  %v244_v6 = vpack.c.bf16 %v242_v2, %v242_v2 }
 0x116   :  { %v245_v5 = vpack.c.bf16 %v243_v4, %v243_v4 }
 0x118   :  { %482 = vmatprep.mubr.bf16.mxu0 %v245_v5 }
 0x119   :  { %483 = vmatmul.mubr.bf16.vlgmr.msra.gmra.mxu0 %v244_v6 }
 0x1d9   :  { %v484_v10 = vpop.f32.mrf.mxu0 }
 0x1da   :  { %v485_v12 = vadd.f32 %v484_v10, %v283_v8 }
 0x1db   :  { %v486_v13 = vpop.f32.mrf.mxu0 }
 0x1dc   :  { %v491_v14 = vmax.f32 %v485_v12, 0.0  ;;  %v487_v15 = vadd.f32 %v486_v13, %v287_v9 }
 0x1dd   :  { %v488_v18 = vpop.f32.mrf.mxu0 }
 0x1de   :  { %v492_v19 = vmax.f32 %v487_v15, 0.0  ;;  %v505_v21 = vmul.f32 %v498_v16, %v491_v14 }
 0x1df   :  { %v489_v20 = vpop.f32.mrf.mxu0 }
 0x1e0   :  { %v506_v22 = vmul.f32 %v502_v17, %v492_v19 }
 0x1e2   :  { %v507_v23 = vadd.f32 %v506_v22, %v505_v21 }
 0x1e4   :  { %508 = vadd.xlane.f32.xlu0 %v507_v23 }
 0x26d   :  { %v509_v25 = vpop.xlane.xlu0 %508 }
 0x26e   :  { %v517_v26 = vadd.f32 %v569_v24, %v509_v25 }
 0x270   :  { %519 = vst.msk [vmem:[%s840_s9] sm:$0xff] %vm518_vm3, %v517_v26 }
 0x271   :  { %524 = vsyncpa [#allocation4], 1 }
 0x272   :  { %525 = vsyncpa [#allocation6], 1 }
 0x273   :  { %526 = vsyncpa [#allocation9], 1 }

</bundles_post_ra>
